<compile_context>
chip_gen: v6e
topology: v6e:2x2x1
jax: 0.10.0
libtpu: 0.0.40
codegen_flags: <defaults>
</compile_context>

<pallas_src>
import jax
import jax.numpy as jnp
from jax.experimental import pallas as pl
from jax.experimental.pallas import tpu as pltpu

LANES = 128
TARGET_BLOCK_BYTES = 4 << 20  # ~4 MiB of payload per block per array


def _round_up(x, m):
    return ((x + m - 1) // m) * m


def _adapt_sigmoid_relu_kernel(params_ref, x_ref, o_ref):
    # params_ref: SMEM (4,) f32 -> [alpha, beta, gamma, delta]
    alpha = params_ref[0]
    beta = params_ref[1]
    gamma = params_ref[2]
    delta = params_ref[3]

    # Compute in f32; cast only at the final store (output dtype = input dtype).
    x = x_ref[...].astype(jnp.float32)

    term1 = alpha * x * jax.nn.sigmoid(beta * x)          # 1 EUP op / elem
    term2 = gamma * jnp.maximum(delta * x, 0.0)           # VPU only

    o_ref[...] = (term1 + term2).astype(o_ref.dtype)


def _run_slab(x2d, params):
    """Stream a lane-dense (rows, 128) slab through the elementwise kernel."""
    rows, _ = x2d.shape
    itemsize = x2d.dtype.itemsize
    # Sublane tile: 8 for f32, 16 for bf16, 32 for int8/fp8.
    sublane = max(8, 32 // itemsize)
    # Keep per-block byte volume ~constant across dtypes (4 MiB target).
    max_block_rows = max(sublane, TARGET_BLOCK_BYTES // (LANES * itemsize))

    if rows < 2 * sublane:
        # Too small to split into two aligned blocks: one full-extent block.
        block_rows = rows
    else:
        # >= 2 grid steps so the "parallel" axis shards across both v7x TCs;
        # cap at ~4 MiB payload per block.
        block_rows = min(max_block_rows, _round_up(pl.cdiv(rows, 2), sublane))
        block_rows = min(block_rows, rows)
    grid = (pl.cdiv(rows, block_rows),)

    block_bytes = block_rows * LANES * itemsize
    # Double-buffered input + output blocks, plus margin for compiler scratch.
    # Explicit so 4 MiB blocks don't hit v5e's 16 MiB default scoped limit;
    # capped well under v7x's 64 MiB physical VMEM per TensorCore.
    vmem_limit = min(max(4 * block_bytes + (8 << 20), 24 << 20), 48 << 20)

    n = rows * LANES
    cost = pl.CostEstimate(
        flops=6 * n, transcendentals=n, bytes_accessed=2 * n * itemsize)

    return pl.pallas_call(
        _adapt_sigmoid_relu_kernel,
        out_shape=jax.ShapeDtypeStruct((rows, LANES), x2d.dtype),
        grid_spec=pltpu.PrefetchScalarGridSpec(
            num_scalar_prefetch=0,
            grid=grid,
            in_specs=[
                pl.BlockSpec(memory_space=pltpu.SMEM),           # params (4,)
                pl.BlockSpec((block_rows, LANES), lambda i: (i, 0)),
            ],
            out_specs=pl.BlockSpec((block_rows, LANES), lambda i: (i, 0)),
        ),
        compiler_params=pltpu.CompilerParams(
            dimension_semantics=("parallel",),
            vmem_limit_bytes=vmem_limit,
        ),
        cost_estimate=cost,
    )(params, x2d)


@jax.jit
def adapt_sigmoid_relu(x, params):
    """Apply f(x) = alpha*x*sigmoid(beta*x) + gamma*relu(delta*x) elementwise.

    x:      any-shape float array (e.g. NCHW (N, C, H, W)), any float dtype.
    params: (4,) float32 vector [alpha, beta, gamma, delta].
    """
    orig_shape = x.shape
    orig_dtype = x.dtype
    n = x.size

    x_flat = x.reshape(-1)
    rem = n % LANES

    if rem == 0:
        # Common case: free reshape to a lane-dense slab, zero extra traffic.
        out2d = _run_slab(x_flat.reshape(n // LANES, LANES), params)
        return out2d.reshape(orig_shape)

    # Ragged tail: stream the 128-aligned bulk through the kernel and handle
    # the (<128-element) tail with plain jnp — no whole-array pad/slice pass.
    n_bulk = n - rem
    alpha, beta, gamma, delta = params[0], params[1], params[2], params[3]

    if n_bulk > 0:
        bulk = _run_slab(
            x_flat[:n_bulk].reshape(n_bulk // LANES, LANES), params
        ).reshape(-1)
    else:
        bulk = jnp.zeros((0,), orig_dtype)

    tail = x_flat[n_bulk:].astype(jnp.float32)
    tail_out = (alpha * tail * jax.nn.sigmoid(beta * tail)
                + gamma * jnp.maximum(delta * tail, 0.0)).astype(orig_dtype)

    return jnp.concatenate([bulk, tail_out]).reshape(orig_shape)


def _reference(x, params):
    alpha, beta, gamma, delta = (params[i] for i in range(4))
    xf = x.astype(jnp.float32)
    term1 = alpha * xf * jax.nn.sigmoid(beta * xf)
    term2 = gamma * jnp.maximum(delta * xf, 0.0)
    return (term1 + term2).astype(x.dtype)


if __name__ == "__main__":
    # Deterministic parameter init matching the PyTorch __init__:
    # alpha=0.5, beta=1.0, gamma_param=0.5, delta=1.0
    params = jnp.array([0.5, 1.0, 0.5, 1.0], dtype=jnp.float32)

    key = jax.random.PRNGKey(0)
    x = jax.random.normal(key, (2, 4, 16, 16), dtype=jnp.float32)  # NCHW

    out = adapt_sigmoid_relu(x, params)
    out = jax.block_until_ready(out)

    ref = _reference(x, params)
    assert out.shape == x.shape and out.dtype == x.dtype
    assert jnp.allclose(out, ref, atol=1e-5, rtol=1e-5), (
        float(jnp.max(jnp.abs(out - ref)))
    )

    # Exercise the ragged (n % 128 != 0) path and partial-last-block writeback.
    x2 = jax.random.normal(jax.random.PRNGKey(1), (3, 5, 7, 11), dtype=jnp.float32)
    out2 = jax.block_until_ready(adapt_sigmoid_relu(x2, params))
    ref2 = _reference(x2, params)
    assert out2.shape == x2.shape and out2.dtype == x2.dtype
    assert jnp.allclose(out2, ref2, atol=1e-5, rtol=1e-5)

    print("KERNEL_OK")
</pallas_src>

<mosaic_0001>
module attributes {stable_mosaic.version = 11 : i64} {
  func.func @_adapt_sigmoid_relu_kernel(%arg0: i32, %arg1: memref<4xf32, #tpu.memory_space<smem>>, %arg2: memref<8x128xf32, #tpu.memory_space<vmem>>, %arg3: memref<8x128xf32, #tpu.memory_space<vmem>>) attributes {dimension_semantics = [#tpu.dimension_semantics<parallel>], iteration_bounds = array<i64: 2>, scalar_prefetch = 0 : i64, scratch_operands = 0 : i64, tpu.core_type = #tpu.core_type<tc>, window_params = [{transform_indices = @transform_0, window_bounds = array<i64: 4>}, {transform_indices = @transform_1, window_bounds = array<i64: 8, 128>}, {transform_indices = @transform_2, window_bounds = array<i64: 8, 128>}]} {
    %c0 = arith.constant 0 : index
    %0 = memref.load %arg1[%c0] : memref<4xf32, #tpu.memory_space<smem>>
    %c1 = arith.constant 1 : index
    %1 = memref.load %arg1[%c1] : memref<4xf32, #tpu.memory_space<smem>>
    %c2 = arith.constant 2 : index
    %2 = memref.load %arg1[%c2] : memref<4xf32, #tpu.memory_space<smem>>
    %c3 = arith.constant 3 : index
    %3 = memref.load %arg1[%c3] : memref<4xf32, #tpu.memory_space<smem>>
    %c0_0 = arith.constant 0 : index
    %c0_1 = arith.constant 0 : index
    %4 = vector.load %arg2[%c0_0, %c0_1] : memref<8x128xf32, #tpu.memory_space<vmem>>, vector<8x128xf32>
    %5 = vector.broadcast %0 : f32 to vector<8x128xf32>
    %6 = arith.mulf %5, %4 : vector<8x128xf32>
    %7 = vector.broadcast %1 : f32 to vector<8x128xf32>
    %8 = arith.mulf %7, %4 : vector<8x128xf32>
    %9 = arith.negf %8 : vector<8x128xf32>
    %10 = math.exp %9 : vector<8x128xf32>
    %cst = arith.constant 1.000000e+00 : f32
    %11 = vector.broadcast %cst : f32 to vector<8x128xf32>
    %12 = arith.addf %11, %10 : vector<8x128xf32>
    %13 = arith.divf %11, %12 : vector<8x128xf32>
    %14 = arith.mulf %6, %13 : vector<8x128xf32>
    %15 = vector.broadcast %3 : f32 to vector<8x128xf32>
    %16 = arith.mulf %15, %4 : vector<8x128xf32>
    %cst_2 = arith.constant 0.000000e+00 : f32
    %17 = vector.broadcast %cst_2 : f32 to vector<8x128xf32>
    %18 = arith.maximumf %16, %17 : vector<8x128xf32>
    %19 = vector.broadcast %2 : f32 to vector<8x128xf32>
    %20 = arith.mulf %19, %18 : vector<8x128xf32>
    %21 = arith.addf %14, %20 : vector<8x128xf32>
    %c0_3 = arith.constant 0 : index
    %c0_4 = arith.constant 0 : index
    %22 = vector.load %arg3[%c0_3, %c0_4] : memref<8x128xf32, #tpu.memory_space<vmem>>, vector<8x128xf32>
    tpu.vector_store %arg3[%c0_3, %c0_4], %21 {strides = array<i32>} : memref<8x128xf32, #tpu.memory_space<vmem>>, vector<8x128xf32>,
    return
  }
  func.func @transform_0(%arg0: i32) -> i32 {
    %c0_i32 = arith.constant 0 : i32
    %c0_i32_0 = arith.constant 0 : i32
    return %c0_i32 : i32
  }
  func.func @transform_1(%arg0: i32) -> (i32, i32) {
    %c0_i32 = arith.constant 0 : i32
    %c0_i32_0 = arith.constant 0 : i32
    return %arg0, %c0_i32 : i32, i32
  }
  func.func @transform_2(%arg0: i32) -> (i32, i32) {
    %c0_i32 = arith.constant 0 : i32
    %c0_i32_0 = arith.constant 0 : i32
    return %arg0, %c0_i32 : i32, i32
  }
}

</mosaic_0001>

<bundles_post_ra>
// kernel: adapt_sigmoid_relu.1
= control target key start
LH: loop header
LB: loop body
LE: loop exit
PB: predicated region body
PF: predicated region fallthrough
CT: control target
= control target key end

     0   :  { %7 = vsyncpa [#allocation3], 0  ;;  %s322_s9 = smov 0   ;;  %s353_s0 = inlined_call_operand.vmem [shape: f32[4], index: 0, kind: input, shape index: {}]   ;;  %s354_s1 = inlined_call_operand.vmem [shape: f32[16,128], index: 1, kind: input, shape index: {}]   ;;  %s355_s2 = inlined_call_operand.vmem [shape: f32[16,128], index: 2, kind: output, shape index: {}]  }
   0x1 LB: > { %s241_s10 = sadd.s32 4294967295, %s304_s9   ;;  %p243_p0 = scmp.ge.s32.totalorder %s304_s9, 1  ;;  %s304_s9 = sphi %s322_s9, %s13_s9  }
   0x2   : > { %p91_p1 = scmp.lt.s32.totalorder %s304_s9, 3  ;;  %s104_s13 = sshll.u32 %s353_s0, 4  ;;  %s105_s13 = int_to_ptr.vmem [resolvable:$true] %s104_s13 }
   0x3   : > { %p264_p3 = scmp.eq.s32.totalorder %s241_s10, 0  ;;  %s279_s15 = scalar_lea.vmem %s105_s13, 16 }
   0x4   : > { %p333_p2 = pnand %p243_p0, %p91_p1  ;;  %p280_p6 = scmp.ne.s32.totalorder %s105_s13, %s279_s15 }
   0x5   : > { %p287_p10 = scmp.lt.s32.totalorder %s105_s13, %s105_s13  ;;  %p288_p11 = scmp.lt.s32.totalorder %s279_s15, %s279_s15 }
   0x6   : > { %p260_p4 = pneg %p333_p2 }
   0x7   : > { %p289_p12 = por %p288_p11, %p287_p10 }
   0x8   : > { %p261_p5 = pnand %p264_p3, %p260_p4 }
   0xa   : > { %p281_p7 = pneg %p261_p5 }
   0xc   : > { %p282_p8 = pnand %p281_p7, %p280_p6 }
   0xe   : > { %p283_p9 = pneg %p282_p8 }
  0x10   : > { %p290_p13 = pnand %p289_p12, %p283_p9 }
  0x12   : > { %293 = shalt.err (!%p290_p13)
}
  0x13   : > { %s306_s16 = smov [#allocation2]   ;;  %124 = sbr.rel (%p333_p2) target bundleno = 73 (0x49), region = 28 }
  0x14   : > { %263 = dma.vmem_to_smem (!%p261_p5), %s105_s13, 16, %s306_s16, [#allocation3]  }
  0x18   : > { %299 = dma.done.wait (%p264_p3), [#allocation3], 16  }
  0x19   : > { %301 = vsyncadd (%p264_p3), [#allocation3], 4294967280 }
  0x1a   : > { %130 = sfence }
  0x1b   : > { %p145_p0 = scmp.lt.s32.totalorder %s241_s10, 1  ;;  %s250_s17 = sld [smem:[#allocation2 + $0x1]] }
  0x1c   : > { %s252_s22 = sld [smem:[#allocation2 + $0x3]] }
  0x1d   : > { %s358_s10 = smov (!%p145_p0, %s241_s10), 1  ;;  %s153_s23 = sld [smem:[#allocation2]] }
  0x1e   : > { %s248_s18 = sshll.u32 %s358_s10, 3  ;;  %s251_s24 = sld [smem:[#allocation2 + $0x2]] }
  0x1f   : > { %s148_s21 = scalar_lea.vmem %s354_s1, %s248_s18  ;;  %s152_s27 = scalar_lea.vmem %s355_s2, %s248_s18 }
  0x20   : > { %v157_v0 = vld [vmem:[%s148_s21] sm:$0xff] }
  0x21   : > { %v160_v1 = vstv %s250_s17 }
  0x22   : > { %v161_v2 = vmul.f32 %v160_v1, %v157_v0  ;;  %v169_v6 = vstv %s252_s22 }
  0x23   : > { %v170_v7 = vmul.f32 %v169_v6, %v157_v0  ;;  %v158_v8 = vstv %s153_s23 }
  0x24   : > { %v253_v3 = vmul.f32 -1.442695, %v161_v2  ;;  %v172_v10 = vstv %s251_s24  ;;  %v159_v11 = vmul.f32 %v158_v8, %v157_v0 }
  0x25   : > { %v171_v9 = vmax.f32 %v170_v7, 0.0 }
  0x26   : > { %275 = vpow2.f32 %v253_v3 }
  0x27   : > { %v173_v12 = vmul.f32 %v172_v10, %v171_v9 }
  0x33   : > { %v276_v4 = vpop.eup %275 }
  0x34   : > { %v165_v5 = vadd.f32 1.0, %v276_v4 }
  0x36   : > { %277 = vrcp.f32 %v165_v5 }
  0x43   : > { %v278_v13 = vpop.eup %277 }
  0x44   : > { %v168_v14 = vmul.f32 %v278_v13, %v159_v11 }
  0x46   : > { %v174_v15 = vadd.f32 %v173_v12, %v168_v14 }
  0x48   : > { %175 = vst [vmem:[%s152_s27] sm:$0xff] %v174_v15 }
  0x49 PF: > { %s13_s9 = sadd.s32 1, %s304_s9  }
  0x4a   : > { %p10_p1 = scmp.ge.s32.totalorder %s13_s9, 4  }
  0x4c   :  { %12 = sbr.rel (!%p10_p1) target bundleno = 1 (0x1), region = 63 }
  0x51   :  { %195 = vsyncpa [#allocation3], 1 }
  0x52   :  { %197 = vsyncpa [#allocation3 + $0x1], 1 }

</bundles_post_ra>
